<compile_context>
chip_gen: v6e
topology: v6e:2x2x1
jax: 0.10.0
libtpu: 0.0.40
codegen_flags: <defaults>
</compile_context>

<pallas_src>
import jax
import jax.numpy as jnp
from jax.experimental import pallas as pl
from jax.experimental.pallas import tpu as pltpu


def _hvac_kernel(x_ref, wT_ref, o_ref):
    """One row-tile of  y = x @ W.T.

    x_ref  : VMEM (tm, K)  tile of flattened input rows
    wT_ref : VMEM (K, N)   weight transposed; constant index_map -> resident
    o_ref  : VMEM (tm, N)  output tile (whole-block, unmasked store)
    """
    o_ref[...] = jnp.dot(
        x_ref[...], wT_ref[...], preferred_element_type=jnp.float32
    ).astype(o_ref.dtype)


def _pick_row_tile(m):
    """Largest convenient row tile that evenly divides m (8-aligned when possible)."""
    for tm in (512, 256, 128, 64, 32, 16, 8):
        if m % tm == 0:
            return tm
    return m  # tiny / ragged M -> single full block (block == full dim is legal)


def hvac_forward(weight, x):
    """y = x @ weight.T  (PyTorch nn.Linear(input_size, output_size, bias=False)).

    weight : (output_size, input_size)   -- PyTorch Linear layout
    x      : (..., input_size)
    returns: (..., output_size)
    """
    *lead, K = x.shape
    N = weight.shape[0]

    x2 = x.reshape(-1, K).astype(jnp.float32)   # flatten leading dims -> rows
    M = x2.shape[0]
    tm = _pick_row_tile(M)

    out = pl.pallas_call(
        _hvac_kernel,
        out_shape=jax.ShapeDtypeStruct((M, N), jnp.float32),
        grid=(M // tm,),
        in_specs=[
            pl.BlockSpec((tm, K), lambda i: (i, 0)),   # row tiles of x
            pl.BlockSpec((K, N), lambda i: (0, 0)),    # weight.T, stationary
        ],
        out_specs=pl.BlockSpec((tm, N), lambda i: (i, 0)),
        compiler_params=pltpu.CompilerParams(
            dimension_semantics=("parallel",),          # rows split across cores
        ),
    )(x2, weight.T.astype(jnp.float32))

    return out.reshape(*lead, N)


if __name__ == "__main__":
    # Small shapes consistent with the module: batch=2, seq=8, input_size=4,
    # output_size=1 (pHVAC thermal-load scaling).
    B, T, F_IN, F_OUT = 2, 8, 4, 1

    root = jax.random.PRNGKey(0)
    kw, kx = jax.random.split(root)

    # PyTorch nn.Linear default init: U(-1/sqrt(in), 1/sqrt(in)), no bias.
    bound = float(1.0 / (F_IN ** 0.5))
    weight = jax.random.uniform(kw, (F_OUT, F_IN), jnp.float32, -bound, bound)
    x = jax.random.normal(kx, (B, T, F_IN), jnp.float32)

    y = jax.jit(hvac_forward)(weight, x)
    y = jax.block_until_ready(y)

    # Pure-JAX reference of the PyTorch forward.
    ref = (x.reshape(-1, F_IN) @ weight.T).reshape(B, T, F_OUT)

    assert y.shape == (B, T, F_OUT)
    assert jnp.allclose(y, ref, atol=1e-5, rtol=1e-5)
    print("KERNEL_OK")
</pallas_src>

<mosaic_0001>
module attributes {stable_mosaic.version = 11 : i64} {
  func.func @_hvac_kernel(%arg0: i32, %arg1: memref<16x4xf32, #tpu.memory_space<vmem>>, %arg2: memref<4x1xf32, #tpu.memory_space<vmem>>, %arg3: memref<16x1xf32, #tpu.memory_space<vmem>>) attributes {dimension_semantics = [#tpu.dimension_semantics<parallel>], iteration_bounds = array<i64: 1>, scalar_prefetch = 0 : i64, scratch_operands = 0 : i64, tpu.core_type = #tpu.core_type<tc>, window_params = [{transform_indices = @transform_0, window_bounds = array<i64: 16, 4>}, {pipeline_mode = #tpu.pipeline_mode<synchronous>, transform_indices = @transform_1, window_bounds = array<i64: 4, 1>}, {transform_indices = @transform_2, window_bounds = array<i64: 16, 1>}]} {
    %c0 = arith.constant 0 : index
    %c0_0 = arith.constant 0 : index
    %0 = vector.load %arg1[%c0, %c0_0] : memref<16x4xf32, #tpu.memory_space<vmem>>, vector<16x4xf32>
    %c0_1 = arith.constant 0 : index
    %c0_2 = arith.constant 0 : index
    %1 = vector.load %arg2[%c0_1, %c0_2] : memref<4x1xf32, #tpu.memory_space<vmem>>, vector<4x1xf32>
    %cst = arith.constant dense<0.000000e+00> : vector<16x1xf32>
    %2 = tpu.matmul %0, %1, %cst {dimension_numbers = #tpu.dot_dimension_numbers<[1], [0], [0], [1], [0, 0, 1, 1], [], []>} : vector<16x4xf32>, vector<4x1xf32>, vector<16x1xf32> -> vector<16x1xf32>
    %c0_3 = arith.constant 0 : index
    %c0_4 = arith.constant 0 : index
    %3 = vector.load %arg3[%c0_3, %c0_4] : memref<16x1xf32, #tpu.memory_space<vmem>>, vector<16x1xf32>
    tpu.vector_store %arg3[%c0_3, %c0_4], %2 {strides = array<i32>} : memref<16x1xf32, #tpu.memory_space<vmem>>, vector<16x1xf32>,
    return
  }
  func.func @transform_0(%arg0: i32) -> (i32, i32) {
    %c0_i32 = arith.constant 0 : i32
    %c0_i32_0 = arith.constant 0 : i32
    return %arg0, %c0_i32 : i32, i32
  }
  func.func @transform_1(%arg0: i32) -> (i32, i32) {
    %c0_i32 = arith.constant 0 : i32
    %c0_i32_0 = arith.constant 0 : i32
    %c0_i32_1 = arith.constant 0 : i32
    return %c0_i32, %c0_i32_0 : i32, i32
  }
  func.func @transform_2(%arg0: i32) -> (i32, i32) {
    %c0_i32 = arith.constant 0 : i32
    %c0_i32_0 = arith.constant 0 : i32
    return %arg0, %c0_i32 : i32, i32
  }
}

</mosaic_0001>

<bundles_post_ra>
// kernel: hvac_forward.1
= control target key start
LH: loop header
LB: loop body
LE: loop exit
PB: predicated region body
PF: predicated region fallthrough
CT: control target
= control target key end

     0   :  { %vm21_vm0 = vcmask 1043456   ;;  %vm14_vm1 = vcmask 31744   ;;  %vm100_vm2 = vcmask 7168   ;;  %s148_s1 = inlined_call_operand.vmem [shape: f32[4,1], index: 1, kind: input, shape index: {}]   ;;  %s149_s0 = inlined_call_operand.vmem [shape: f32[16,4], index: 0, kind: input, shape index: {}]   ;;  %s150_s2 = inlined_call_operand.vmem [shape: f32[16,1], index: 2, kind: output, shape index: {}]  }
   0x1   :  { %v13_v0 = vld [vmem:[%s148_s1] sm:$0xf]  ;;  %v12_v2 = vld [vmem:[%s149_s0 + $0x8] sm:$0xff] }
   0x2   :  { %v11_v1 = vld [vmem:[%s149_s0] sm:$0xff]  ;;  %113 = vmatprep.subr.msk.mxu0 %vm21_vm0, %v13_v0 }
   0x3   :  { %115 = vmatprep.mubr.msk.f32.mxu0 %vm14_vm1, %v11_v1  ;;  %114 = vmatpush3.msk.msra.mxu0 %vm21_vm0, %v13_v0 }
   0x4   :  { %116 = vmatmul.mubr.msk.f32.vlgmr.msra.gmra.mxu0 %vm14_vm1, %v12_v2 }
  0xc4   :  { %v117_v3 = vpop.f32.mrf.mxu0 }
  0xc5   :  { %102 = vst.msk [vmem:[%s150_s2 + $0x8] sm:$0xff] %vm100_vm2, %v117_v3 }
  0xc6   :  { %v91_v4 = vpop.f32.mrf.mxu0 }
  0xc7   :  { %101 = vst.msk [vmem:[%s150_s2] sm:$0xff] %vm100_vm2, %v91_v4 }

</bundles_post_ra>
